<compile_context>
chip_gen: v7x
topology: tpu7x:2x2x1
jax: 0.10.0
libtpu: 0.0.40
codegen_flags: <defaults>
</compile_context>

<pallas_src>
import functools

import jax
import jax.numpy as jnp
import numpy as np
from jax.experimental import pallas as pl
from jax.experimental.pallas import tpu as pltpu


def _round_up(v, m):
    return (v + m - 1) // m * m


def _prcn_kernel(xf_ref, w3_ref, p2_ref, p1_ref, w2_ref, out_ref, *, H, W, gr):
    """One batch element per grid step.

    xf_ref : (1, 2*gr, Lp)  bn1-applied input in permuted [even ; odd] channel
             order, zero-padded by one row top/bottom, flattened (row-major) on
             lanes with a 1-element front pad and zero tail up to Lp (mult of 128).
    w3_ref : (2*gr, 9)      per-channel 3x3 taps (tap index = 3*dy + dx).
    p2_ref : (2*gr, 2)      columns [bn2_scale, bn2_bias]  (position order of out_shuff).
    p1_ref : (gr, 4)        columns [w1_even, w1_odd, bn3_scale, bn3_bias].
    w2_ref : (gr, gr)       conv2 1x1 weight [out, in].
    out_ref: (1, 2*gr, H*W) rows [conv2 output ; channel-pair max-pool].
    """
    HW = H * W
    C2 = 2 * gr
    Lp = xf_ref.shape[2]

    xf = xf_ref[0]            # (C2, Lp)
    w3 = w3_ref[...]          # (C2, 9)
    p2 = p2_ref[...]          # (C2, 2)
    p1 = p1_ref[...]          # (gr, 4)
    w2 = w2_ref[...]          # (gr, gr)

    # The flattened rows carry no W padding; taps that would read across a row
    # boundary are killed by zeroing the offending column ONCE (hoisted) and
    # reusing that source for all 3 taps of the same dx.
    jcol = (jax.lax.broadcasted_iota(jnp.int32, (1, Lp), 1) + (W - 1)) % W
    xf_dx0 = xf * (jcol != W - 1).astype(jnp.float32)   # used by dx == 0 taps
    xf_dx2 = xf * (jcol != 0).astype(jnp.float32)       # used by dx == 2 taps
    srcs = (xf_dx0, xf, xf_dx2)

    # 3x3 depthwise conv over the merged 2*gr permuted channels -> out_shuff.
    # Each tap is a static lane-offset view (dy*W + dx) of the flat padded image.
    acc = jnp.zeros((C2, HW), jnp.float32)
    for dy in range(3):
        for dx in range(3):
            o = dy * W + dx
            t = srcs[dx][:, o:o + HW]                       # (C2, HW)
            acc = acc + t * w3[:, 3 * dy + dx:3 * dy + dx + 1]

    # MaxPool3d((2,1,1)) over permuted channel pairs == max(even half, odd half).
    pool = jnp.maximum(acc[:gr, :], acc[gr:, :])

    # relu(bn2(out_shuff)) on the full 2*gr stream, then the grouped 1x1 conv1
    # (mixes the matching even/odd positions), then relu(bn3(.)).
    r = jnp.maximum(acc * p2[:, 0:1] + p2[:, 1:2], 0.0)
    z = r[:gr, :] * p1[:, 0:1] + r[gr:, :] * p1[:, 1:2]
    z = jnp.maximum(z * p1[:, 2:3] + p1[:, 3:4], 0.0)

    # conv2 (full 1x1). gr is tiny, so use VPU broadcast-MACs rather than an
    # almost-empty MXU contraction; for large gr use jnp.dot(w2, z) instead.
    y = jnp.zeros((gr, HW), jnp.float32)
    for ci in range(gr):
        y = y + z[ci:ci + 1, :] * w2[:, ci:ci + 1]

    out_ref[0] = jnp.concatenate([y, pool], axis=0)         # one full-block store


def init_params(key, in_planes, growth_rate):
    G = 2
    gr = growth_rate
    ks = jax.random.split(key, 8)

    def bn(k, c):
        k1, k2, k3, k4 = jax.random.split(k, 4)
        return dict(
            gamma=jax.random.uniform(k1, (c,), jnp.float32, 0.5, 1.5),
            beta=jax.random.normal(k2, (c,), jnp.float32) * 0.1,
            mean=jax.random.normal(k3, (c,), jnp.float32) * 0.1,
            var=jax.random.uniform(k4, (c,), jnp.float32, 0.5, 1.5),
        )

    chan_perm = np.asarray(jax.random.permutation(ks[7], in_planes))
    return dict(
        w3=jax.random.normal(ks[0], (G * gr, 1, 3, 3), jnp.float32) * 0.2,  # conv1_prcn
        w1=jax.random.normal(ks[1], (gr, G, 1, 1), jnp.float32) * 0.2,      # conv1 (grouped)
        w2=jax.random.normal(ks[2], (gr, gr, 1, 1), jnp.float32) * 0.2,     # conv2
        bn1=bn(ks[3], gr),
        bn2=bn(ks[4], G * gr),
        bn3=bn(ks[5], gr),
        index_1=np.asarray(jax.random.permutation(ks[6], G * gr)),          # static indices
        index_in=chan_perm[:gr],
        index_out=chan_perm[gr:],
    )


def prcn_v8_forward(x, p, growth_rate):
    N, _, H, W = x.shape
    gr = growth_rate
    G = 2
    C2 = G * gr
    HW = H * W
    eps = 1e-5

    def affine(bn):
        s = bn['gamma'] / jnp.sqrt(bn['var'] + eps)
        return s, bn['beta'] - bn['mean'] * s

    s1, b1 = affine(p['bn1'])            # per x_sel channel (gr,)
    s2, b2 = affine(p['bn2'])            # per out_shuff position (2gr,)
    s3, b3 = affine(p['bn3'])            # (gr,)

    idx1 = np.asarray(p['index_1'])
    index_in = np.asarray(p['index_in'])
    index_out = np.asarray(p['index_out'])
    # merged channel order = [even positions of out_shuff ; odd positions]
    perm = np.concatenate([idx1[0::2], idx1[1::2]])     # conv-output channel ids
    src_local = perm // G                               # source channel within x_sel
    src_x = index_in[src_local]                         # source channel within x

    # per-merged-position parameters (index_1 folded into weight/param layout)
    s1m, b1m = s1[src_local], b1[src_local]
    w3 = p['w3'][:, 0, :, :]                            # (2gr, 3, 3)
    w3m = w3[perm].reshape(C2, 9)
    s2p = jnp.concatenate([s2[0::2], s2[1::2]])         # bn2 is position-indexed
    b2p = jnp.concatenate([b2[0::2], b2[1::2]])
    p2 = jnp.stack([s2p, b2p], axis=1)                  # (2gr, 2)
    w1 = p['w1'][:, :, 0, 0]                            # (gr, 2)
    p1 = jnp.stack([w1[:, 0], w1[:, 1], s3, b3], axis=1)  # (gr, 4)
    w2m = p['w2'][:, :, 0, 0]                           # (gr, gr)

    # Kernel input: one fused XLA gather+affine+pad+reshape (no transposes).
    # Rows padded 1 top / 1 bottom for the 3x3, flattened with 1 front zero and a
    # zero tail so the lane extent is a multiple of 128 and all 9 tap views fit.
    Lp = _round_up(HW + 2 * W + 2, 128)
    xg = x[:, src_x, :, :] * s1m[None, :, None, None] + b1m[None, :, None, None]
    xg = jnp.pad(xg, ((0, 0), (0, 0), (1, 1), (0, 0)))          # (N, 2gr, H+2, W)
    xf = xg.reshape(N, C2, (H + 2) * W)
    xf = jnp.pad(xf, ((0, 0), (0, 0), (1, Lp - (H + 2) * W - 1)))

    kernel = functools.partial(_prcn_kernel, H=H, W=W, gr=gr)
    # TODO(synk): for production H*W / gr, add a spatial (row-block) grid axis with a
    # one-row halo and pack several batch elements per step, so double-buffered blocks
    # stay within v7x's 64 MiB VMEM while amortizing the ~0.35us per-step overhead.
    out_flat = pl.pallas_call(
        kernel,
        out_shape=jax.ShapeDtypeStruct((N, C2, HW), jnp.float32),
        grid=(N,),
        in_specs=[
            pl.BlockSpec((1, C2, Lp), lambda b: (b, 0, 0)),
            pl.BlockSpec((C2, 9), lambda b: (0, 0)),
            pl.BlockSpec((C2, 2), lambda b: (0, 0)),
            pl.BlockSpec((gr, 4), lambda b: (0, 0)),
            pl.BlockSpec((gr, gr), lambda b: (0, 0)),
        ],
        out_specs=pl.BlockSpec((1, C2, HW), lambda b: (b, 0, 0)),
        compiler_params=pltpu.CompilerParams(
            dimension_semantics=("parallel",),
            vmem_limit_bytes=32 * 1024 * 1024),
    )(xf, w3m, p2, p1, w2m)

    y = out_flat[:, :gr, :].reshape(N, gr, H, W)
    pool = out_flat[:, gr:, :].reshape(N, gr, H, W)
    out = jnp.concatenate([y, pool, x[:, index_out, :, :]], axis=1)
    # The reference computes `put = bn4(out)` but returns `out` (pre-bn4) -> bn4 omitted.
    # TODO(synk): training-mode BatchNorm (batch statistics + running-stat updates) is
    # not reproduced; all BNs use inference-mode running-stat affine transforms.
    return out


def _reference_forward(x, p, gr):
    """Straightforward pure-JAX port of the PyTorch forward (eval-mode BN)."""
    eps = 1e-5
    G = 2
    N, _, H, W = x.shape

    def bn(v, b):
        s = b['gamma'] / jnp.sqrt(b['var'] + eps)
        o = b['beta'] - b['mean'] * s
        return v * s[None, :, None, None] + o[None, :, None, None]

    idx1 = np.asarray(p['index_1'])
    index_in = np.asarray(p['index_in'])
    index_out = np.asarray(p['index_out'])

    xs = bn(x[:, index_in, :, :], p['bn1'])
    xpad = jnp.pad(xs, ((0, 0), (0, 0), (1, 1), (1, 1)))
    w3 = p['w3'][:, 0, :, :]
    chans = []
    for j in range(G * gr):
        src = j // G
        a = jnp.zeros((N, H, W), jnp.float32)
        for dy in range(3):
            for dx in range(3):
                a = a + xpad[:, src, dy:dy + H, dx:dx + W] * w3[j, dy, dx]
        chans.append(a)
    conv = jnp.stack(chans, axis=1)
    out_shuff = conv[:, idx1, :, :]
    pool = jnp.maximum(out_shuff[:, 0::2], out_shuff[:, 1::2])
    r = jax.nn.relu(bn(out_shuff, p['bn2']))
    w1 = p['w1'][:, :, 0, 0]
    o1 = (r[:, 0::2] * w1[:, 0][None, :, None, None]
          + r[:, 1::2] * w1[:, 1][None, :, None, None])
    z = jax.nn.relu(bn(o1, p['bn3']))
    w2 = p['w2'][:, :, 0, 0]
    o2 = jnp.einsum('oi,nihw->nohw', w2, z, precision=jax.lax.Precision.HIGHEST)
    return jnp.concatenate([o2, pool, x[:, index_out, :, :]], axis=1)


if __name__ == "__main__":
    in_planes = 8
    growth_rate = 4
    N, H, W = 2, 16, 16

    key = jax.random.PRNGKey(0)
    kx, kp = jax.random.split(key)
    x = jax.random.normal(kx, (N, in_planes, H, W), jnp.float32)
    params = init_params(kp, in_planes, growth_rate)

    out = jax.block_until_ready(prcn_v8_forward(x, params, growth_rate))
    assert out.shape == (N, in_planes + growth_rate, H, W), out.shape
    assert bool(jnp.all(jnp.isfinite(out)))

    ref = jax.block_until_ready(_reference_forward(x, params, growth_rate))
    np.testing.assert_allclose(np.asarray(out), np.asarray(ref), rtol=2e-3, atol=2e-3)

    print("KERNEL_OK")
</pallas_src>

<mosaic_0001>
module attributes {stable_mosaic.version = 11 : i64} {
  func.func @_prcn_kernel(%arg0: i32, %arg1: memref<1x8x384xf32, #tpu.memory_space<vmem>>, %arg2: memref<8x9xf32, #tpu.memory_space<vmem>>, %arg3: memref<8x2xf32, #tpu.memory_space<vmem>>, %arg4: memref<4x4xf32, #tpu.memory_space<vmem>>, %arg5: memref<4x4xf32, #tpu.memory_space<vmem>>, %arg6: memref<1x8x256xf32, #tpu.memory_space<vmem>>) attributes {dimension_semantics = [#tpu.dimension_semantics<parallel>], iteration_bounds = array<i64: 2>, scalar_prefetch = 0 : i64, scratch_operands = 0 : i64, tpu.core_type = #tpu.core_type<tc>, window_params = [{transform_indices = @transform_0, window_bounds = array<i64: 1, 8, 384>}, {pipeline_mode = #tpu.pipeline_mode<synchronous>, transform_indices = @transform_1, window_bounds = array<i64: 8, 9>}, {pipeline_mode = #tpu.pipeline_mode<synchronous>, transform_indices = @transform_2, window_bounds = array<i64: 8, 2>}, {pipeline_mode = #tpu.pipeline_mode<synchronous>, transform_indices = @transform_3, window_bounds = array<i64: 4, 4>}, {pipeline_mode = #tpu.pipeline_mode<synchronous>, transform_indices = @transform_4, window_bounds = array<i64: 4, 4>}, {transform_indices = @transform_5, window_bounds = array<i64: 1, 8, 256>}]} {
    %c0 = arith.constant 0 : index
    %c0_0 = arith.constant 0 : index
    %c0_1 = arith.constant 0 : index
    %0 = vector.load %arg1[%c0, %c0_0, %c0_1] : memref<1x8x384xf32, #tpu.memory_space<vmem>>, vector<1x8x384xf32>
    %1 = vector.shape_cast %0 : vector<1x8x384xf32> to vector<8x384xf32>
    %c0_2 = arith.constant 0 : index
    %c0_3 = arith.constant 0 : index
    %2 = vector.load %arg2[%c0_2, %c0_3] : memref<8x9xf32, #tpu.memory_space<vmem>>, vector<8x9xf32>
    %c0_4 = arith.constant 0 : index
    %c0_5 = arith.constant 0 : index
    %3 = vector.load %arg3[%c0_4, %c0_5] : memref<8x2xf32, #tpu.memory_space<vmem>>, vector<8x2xf32>
    %c0_6 = arith.constant 0 : index
    %c0_7 = arith.constant 0 : index
    %4 = vector.load %arg4[%c0_6, %c0_7] : memref<4x4xf32, #tpu.memory_space<vmem>>, vector<4x4xf32>
    %c0_8 = arith.constant 0 : index
    %c0_9 = arith.constant 0 : index
    %5 = vector.load %arg5[%c0_8, %c0_9] : memref<4x4xf32, #tpu.memory_space<vmem>>, vector<4x4xf32>
    %6 = tpu.iota {dimensions = array<i32: 1>} : vector<1x384xi32>
    %c15_i32 = arith.constant 15 : i32
    %7 = vector.broadcast %c15_i32 : i32 to vector<1x384xi32>
    %8 = arith.addi %6, %7 : vector<1x384xi32>
    %c16_i32 = arith.constant 16 : i32
    %c0_i32 = arith.constant 0 : i32
    %9 = arith.cmpi eq, %c16_i32, %c0_i32 : i32
    %c1_i32 = arith.constant 1 : i32
    %10 = arith.select %9, %c1_i32, %c16_i32 : i32
    %11 = vector.broadcast %10 : i32 to vector<1x384xi32>
    %12 = arith.remsi %8, %11 : vector<1x384xi32>
    %c0_i32_10 = arith.constant 0 : i32
    %13 = vector.broadcast %c0_i32_10 : i32 to vector<1x384xi32>
    %14 = arith.cmpi ne, %12, %13 : vector<1x384xi32>
    %c0_i32_11 = arith.constant 0 : i32
    %15 = vector.broadcast %c0_i32_11 : i32 to vector<1x384xi32>
    %16 = arith.cmpi slt, %12, %15 : vector<1x384xi32>
    %c0_i32_12 = arith.constant 0 : i32
    %17 = arith.cmpi slt, %10, %c0_i32_12 : i32
    %18 = vector.broadcast %17 : i1 to vector<1x384xi1>
    %19 = vector.broadcast %18 : vector<1x384xi1> to vector<1x384xi1>
    %20 = arith.xori %16, %19 : vector<1x384xi1>
    %21 = arith.andi %20, %14 : vector<1x384xi1>
    %22 = vector.broadcast %10 : i32 to vector<1x384xi32>
    %23 = arith.addi %12, %22 : vector<1x384xi32>
    %24 = arith.select %21, %23, %12 : vector<1x384xi1>, vector<1x384xi32>
    %c15_i32_13 = arith.constant 15 : i32
    %25 = vector.broadcast %c15_i32_13 : i32 to vector<1x384xi32>
    %26 = arith.cmpi ne, %24, %25 : vector<1x384xi32>
    %27 = arith.extui %26 : vector<1x384xi1> to vector<1x384xi32>
    %28 = arith.sitofp %27 : vector<1x384xi32> to vector<1x384xf32>
    %29 = vector.broadcast %28 : vector<1x384xf32> to vector<8x384xf32>
    %30 = arith.mulf %1, %29 : vector<8x384xf32>
    %c0_i32_14 = arith.constant 0 : i32
    %31 = vector.broadcast %c0_i32_14 : i32 to vector<1x384xi32>
    %32 = arith.cmpi ne, %24, %31 : vector<1x384xi32>
    %33 = arith.extui %32 : vector<1x384xi1> to vector<1x384xi32>
    %34 = arith.sitofp %33 : vector<1x384xi32> to vector<1x384xf32>
    %35 = vector.broadcast %34 : vector<1x384xf32> to vector<8x384xf32>
    %36 = arith.mulf %1, %35 : vector<8x384xf32>
    %cst = arith.constant 0.000000e+00 : f32
    %37 = vector.broadcast %cst : f32 to vector<8x256xf32>
    %38 = vector.extract_strided_slice %30 {offsets = [0, 0], sizes = [8, 256], strides = [1, 1]} : vector<8x384xf32> to vector<8x256xf32>
    %39 = vector.extract_strided_slice %2 {offsets = [0, 0], sizes = [8, 1], strides = [1, 1]} : vector<8x9xf32> to vector<8x1xf32>
    %40 = vector.broadcast %39 : vector<8x1xf32> to vector<8x256xf32>
    %41 = arith.mulf %38, %40 : vector<8x256xf32>
    %42 = arith.addf %37, %41 : vector<8x256xf32>
    %43 = vector.extract_strided_slice %1 {offsets = [0, 1], sizes = [8, 256], strides = [1, 1]} : vector<8x384xf32> to vector<8x256xf32>
    %44 = vector.extract_strided_slice %2 {offsets = [0, 1], sizes = [8, 1], strides = [1, 1]} : vector<8x9xf32> to vector<8x1xf32>
    %45 = vector.broadcast %44 : vector<8x1xf32> to vector<8x256xf32>
    %46 = arith.mulf %43, %45 : vector<8x256xf32>
    %47 = arith.addf %42, %46 : vector<8x256xf32>
    %48 = vector.extract_strided_slice %36 {offsets = [0, 2], sizes = [8, 256], strides = [1, 1]} : vector<8x384xf32> to vector<8x256xf32>
    %49 = vector.extract_strided_slice %2 {offsets = [0, 2], sizes = [8, 1], strides = [1, 1]} : vector<8x9xf32> to vector<8x1xf32>
    %50 = vector.broadcast %49 : vector<8x1xf32> to vector<8x256xf32>
    %51 = arith.mulf %48, %50 : vector<8x256xf32>
    %52 = arith.addf %47, %51 : vector<8x256xf32>
    %53 = vector.extract_strided_slice %30 {offsets = [0, 16], sizes = [8, 256], strides = [1, 1]} : vector<8x384xf32> to vector<8x256xf32>
    %54 = vector.extract_strided_slice %2 {offsets = [0, 3], sizes = [8, 1], strides = [1, 1]} : vector<8x9xf32> to vector<8x1xf32>
    %55 = vector.broadcast %54 : vector<8x1xf32> to vector<8x256xf32>
    %56 = arith.mulf %53, %55 : vector<8x256xf32>
    %57 = arith.addf %52, %56 : vector<8x256xf32>
    %58 = vector.extract_strided_slice %1 {offsets = [0, 17], sizes = [8, 256], strides = [1, 1]} : vector<8x384xf32> to vector<8x256xf32>
    %59 = vector.extract_strided_slice %2 {offsets = [0, 4], sizes = [8, 1], strides = [1, 1]} : vector<8x9xf32> to vector<8x1xf32>
    %60 = vector.broadcast %59 : vector<8x1xf32> to vector<8x256xf32>
    %61 = arith.mulf %58, %60 : vector<8x256xf32>
    %62 = arith.addf %57, %61 : vector<8x256xf32>
    %63 = vector.extract_strided_slice %36 {offsets = [0, 18], sizes = [8, 256], strides = [1, 1]} : vector<8x384xf32> to vector<8x256xf32>
    %64 = vector.extract_strided_slice %2 {offsets = [0, 5], sizes = [8, 1], strides = [1, 1]} : vector<8x9xf32> to vector<8x1xf32>
    %65 = vector.broadcast %64 : vector<8x1xf32> to vector<8x256xf32>
    %66 = arith.mulf %63, %65 : vector<8x256xf32>
    %67 = arith.addf %62, %66 : vector<8x256xf32>
    %68 = vector.extract_strided_slice %30 {offsets = [0, 32], sizes = [8, 256], strides = [1, 1]} : vector<8x384xf32> to vector<8x256xf32>
    %69 = vector.extract_strided_slice %2 {offsets = [0, 6], sizes = [8, 1], strides = [1, 1]} : vector<8x9xf32> to vector<8x1xf32>
    %70 = vector.broadcast %69 : vector<8x1xf32> to vector<8x256xf32>
    %71 = arith.mulf %68, %70 : vector<8x256xf32>
    %72 = arith.addf %67, %71 : vector<8x256xf32>
    %73 = vector.extract_strided_slice %1 {offsets = [0, 33], sizes = [8, 256], strides = [1, 1]} : vector<8x384xf32> to vector<8x256xf32>
    %74 = vector.extract_strided_slice %2 {offsets = [0, 7], sizes = [8, 1], strides = [1, 1]} : vector<8x9xf32> to vector<8x1xf32>
    %75 = vector.broadcast %74 : vector<8x1xf32> to vector<8x256xf32>
    %76 = arith.mulf %73, %75 : vector<8x256xf32>
    %77 = arith.addf %72, %76 : vector<8x256xf32>
    %78 = vector.extract_strided_slice %36 {offsets = [0, 34], sizes = [8, 256], strides = [1, 1]} : vector<8x384xf32> to vector<8x256xf32>
    %79 = vector.extract_strided_slice %2 {offsets = [0, 8], sizes = [8, 1], strides = [1, 1]} : vector<8x9xf32> to vector<8x1xf32>
    %80 = vector.broadcast %79 : vector<8x1xf32> to vector<8x256xf32>
    %81 = arith.mulf %78, %80 : vector<8x256xf32>
    %82 = arith.addf %77, %81 : vector<8x256xf32>
    %83 = vector.extract_strided_slice %82 {offsets = [0, 0], sizes = [4, 256], strides = [1, 1]} : vector<8x256xf32> to vector<4x256xf32>
    %84 = vector.extract_strided_slice %82 {offsets = [4, 0], sizes = [4, 256], strides = [1, 1]} : vector<8x256xf32> to vector<4x256xf32>
    %85 = arith.maximumf %83, %84 : vector<4x256xf32>
    %86 = vector.extract_strided_slice %3 {offsets = [0, 0], sizes = [8, 1], strides = [1, 1]} : vector<8x2xf32> to vector<8x1xf32>
    %87 = vector.broadcast %86 : vector<8x1xf32> to vector<8x256xf32>
    %88 = arith.mulf %82, %87 : vector<8x256xf32>
    %89 = vector.extract_strided_slice %3 {offsets = [0, 1], sizes = [8, 1], strides = [1, 1]} : vector<8x2xf32> to vector<8x1xf32>
    %90 = vector.broadcast %89 : vector<8x1xf32> to vector<8x256xf32>
    %91 = arith.addf %88, %90 : vector<8x256xf32>
    %cst_15 = arith.constant 0.000000e+00 : f32
    %92 = vector.broadcast %cst_15 : f32 to vector<8x256xf32>
    %93 = arith.maximumf %91, %92 : vector<8x256xf32>
    %94 = vector.extract_strided_slice %93 {offsets = [0, 0], sizes = [4, 256], strides = [1, 1]} : vector<8x256xf32> to vector<4x256xf32>
    %95 = vector.extract_strided_slice %4 {offsets = [0, 0], sizes = [4, 1], strides = [1, 1]} : vector<4x4xf32> to vector<4x1xf32>
    %96 = vector.broadcast %95 : vector<4x1xf32> to vector<4x256xf32>
    %97 = arith.mulf %94, %96 : vector<4x256xf32>
    %98 = vector.extract_strided_slice %93 {offsets = [4, 0], sizes = [4, 256], strides = [1, 1]} : vector<8x256xf32> to vector<4x256xf32>
    %99 = vector.extract_strided_slice %4 {offsets = [0, 1], sizes = [4, 1], strides = [1, 1]} : vector<4x4xf32> to vector<4x1xf32>
    %100 = vector.broadcast %99 : vector<4x1xf32> to vector<4x256xf32>
    %101 = arith.mulf %98, %100 : vector<4x256xf32>
    %102 = arith.addf %97, %101 : vector<4x256xf32>
    %103 = vector.extract_strided_slice %4 {offsets = [0, 2], sizes = [4, 1], strides = [1, 1]} : vector<4x4xf32> to vector<4x1xf32>
    %104 = vector.broadcast %103 : vector<4x1xf32> to vector<4x256xf32>
    %105 = arith.mulf %102, %104 : vector<4x256xf32>
    %106 = vector.extract_strided_slice %4 {offsets = [0, 3], sizes = [4, 1], strides = [1, 1]} : vector<4x4xf32> to vector<4x1xf32>
    %107 = vector.broadcast %106 : vector<4x1xf32> to vector<4x256xf32>
    %108 = arith.addf %105, %107 : vector<4x256xf32>
    %cst_16 = arith.constant 0.000000e+00 : f32
    %109 = vector.broadcast %cst_16 : f32 to vector<4x256xf32>
    %110 = arith.maximumf %108, %109 : vector<4x256xf32>
    %cst_17 = arith.constant 0.000000e+00 : f32
    %111 = vector.broadcast %cst_17 : f32 to vector<4x256xf32>
    %112 = vector.extract_strided_slice %110 {offsets = [0, 0], sizes = [1, 256], strides = [1, 1]} : vector<4x256xf32> to vector<1x256xf32>
    %113 = vector.extract_strided_slice %5 {offsets = [0, 0], sizes = [4, 1], strides = [1, 1]} : vector<4x4xf32> to vector<4x1xf32>
    %114 = vector.broadcast %112 : vector<1x256xf32> to vector<4x256xf32>
    %115 = vector.broadcast %113 : vector<4x1xf32> to vector<4x256xf32>
    %116 = arith.mulf %114, %115 : vector<4x256xf32>
    %117 = arith.addf %111, %116 : vector<4x256xf32>
    %118 = vector.extract_strided_slice %110 {offsets = [1, 0], sizes = [1, 256], strides = [1, 1]} : vector<4x256xf32> to vector<1x256xf32>
    %119 = vector.extract_strided_slice %5 {offsets = [0, 1], sizes = [4, 1], strides = [1, 1]} : vector<4x4xf32> to vector<4x1xf32>
    %120 = vector.broadcast %118 : vector<1x256xf32> to vector<4x256xf32>
    %121 = vector.broadcast %119 : vector<4x1xf32> to vector<4x256xf32>
    %122 = arith.mulf %120, %121 : vector<4x256xf32>
    %123 = arith.addf %117, %122 : vector<4x256xf32>
    %124 = vector.extract_strided_slice %110 {offsets = [2, 0], sizes = [1, 256], strides = [1, 1]} : vector<4x256xf32> to vector<1x256xf32>
    %125 = vector.extract_strided_slice %5 {offsets = [0, 2], sizes = [4, 1], strides = [1, 1]} : vector<4x4xf32> to vector<4x1xf32>
    %126 = vector.broadcast %124 : vector<1x256xf32> to vector<4x256xf32>
    %127 = vector.broadcast %125 : vector<4x1xf32> to vector<4x256xf32>
    %128 = arith.mulf %126, %127 : vector<4x256xf32>
    %129 = arith.addf %123, %128 : vector<4x256xf32>
    %130 = vector.extract_strided_slice %110 {offsets = [3, 0], sizes = [1, 256], strides = [1, 1]} : vector<4x256xf32> to vector<1x256xf32>
    %131 = vector.extract_strided_slice %5 {offsets = [0, 3], sizes = [4, 1], strides = [1, 1]} : vector<4x4xf32> to vector<4x1xf32>
    %132 = vector.broadcast %130 : vector<1x256xf32> to vector<4x256xf32>
    %133 = vector.broadcast %131 : vector<4x1xf32> to vector<4x256xf32>
    %134 = arith.mulf %132, %133 : vector<4x256xf32>
    %135 = arith.addf %129, %134 : vector<4x256xf32>
    %136 = tpu.concatenate %135, %85 in 0 : vector<4x256xf32>, vector<4x256xf32> -> vector<8x256xf32>
    %c0_18 = arith.constant 0 : index
    %c0_19 = arith.constant 0 : index
    %c0_20 = arith.constant 0 : index
    %137 = vector.load %arg6[%c0_18, %c0_19, %c0_20] : memref<1x8x256xf32, #tpu.memory_space<vmem>>, vector<1x8x256xf32>
    %138 = vector.shape_cast %137 : vector<1x8x256xf32> to vector<8x256xf32>
    %139 = vector.shape_cast %136 : vector<8x256xf32> to vector<1x8x256xf32>
    tpu.vector_store %arg6[%c0_18, %c0_19, %c0_20], %139 {strides = array<i32>} : memref<1x8x256xf32, #tpu.memory_space<vmem>>, vector<1x8x256xf32>,
    return
  }
  func.func @transform_0(%arg0: i32) -> (i32, i32, i32) {
    %c0_i32 = arith.constant 0 : i32
    %c0_i32_0 = arith.constant 0 : i32
    %c0_i32_1 = arith.constant 0 : i32
    return %arg0, %c0_i32, %c0_i32_0 : i32, i32, i32
  }
  func.func @transform_1(%arg0: i32) -> (i32, i32) {
    %c0_i32 = arith.constant 0 : i32
    %c0_i32_0 = arith.constant 0 : i32
    %c0_i32_1 = arith.constant 0 : i32
    return %c0_i32, %c0_i32_0 : i32, i32
  }
  func.func @transform_2(%arg0: i32) -> (i32, i32) {
    %c0_i32 = arith.constant 0 : i32
    %c0_i32_0 = arith.constant 0 : i32
    %c0_i32_1 = arith.constant 0 : i32
    return %c0_i32, %c0_i32_0 : i32, i32
  }
  func.func @transform_3(%arg0: i32) -> (i32, i32) {
    %c0_i32 = arith.constant 0 : i32
    %c0_i32_0 = arith.constant 0 : i32
    %c0_i32_1 = arith.constant 0 : i32
    return %c0_i32, %c0_i32_0 : i32, i32
  }
  func.func @transform_4(%arg0: i32) -> (i32, i32) {
    %c0_i32 = arith.constant 0 : i32
    %c0_i32_0 = arith.constant 0 : i32
    %c0_i32_1 = arith.constant 0 : i32
    return %c0_i32, %c0_i32_0 : i32, i32
  }
  func.func @transform_5(%arg0: i32) -> (i32, i32, i32) {
    %c0_i32 = arith.constant 0 : i32
    %c0_i32_0 = arith.constant 0 : i32
    %c0_i32_1 = arith.constant 0 : i32
    return %arg0, %c0_i32, %c0_i32_0 : i32, i32, i32
  }
}

</mosaic_0001>

<bundles_post_ra>
// kernel: tpu_custom_call.1
= control target key start
LH: loop header
LB: loop body
LE: loop exit
PB: predicated region body
PF: predicated region fallthrough
CT: control target
= control target key end

     0   :  { %10 = vsyncpa [#allocation3], 0  ;;  %s1206_s0 = inlined_call_operand.hbm [shape: f32[2,8,384], index: 0, kind: input, shape index: {}]   ;;  %s1207_s1 = inlined_call_operand.vmem [shape: f32[8,9], index: 1, kind: input, shape index: {}]   ;;  %s1208_s2 = inlined_call_operand.vmem [shape: f32[8,2], index: 2, kind: input, shape index: {}]   ;;  %s1209_s3 = inlined_call_operand.vmem [shape: f32[4,4], index: 3, kind: input, shape index: {}]   ;;  %s1210_s4 = inlined_call_operand.vmem [shape: f32[4,4], index: 4, kind: input, shape index: {}]   ;;  %s1211_s5 = inlined_call_operand.hbm [shape: f32[2,8,256], index: 5, kind: output, shape index: {}]  }
   0x1   :  { %12 = vsyncpa [#allocation3 + $0x1], 0 }
   0x2   :  { %13 = vsyncpa [#allocation4], 0 }
   0x3   :  { %15 = vsyncpa [#allocation4 + $0x1], 0  ;;  %s978_s18 = smov 0   ;;  %s980_s19 = smov 0  }
   0x4   :  { %s982_s20 = smov 0   ;;  %s984_s21 = smov 0  }
   0x5 LB: > { %s999_s22 = sadd.s32 4294967295, %s926_s21   ;;  %s728_s23 = sadd.s32 4294967294, %s926_s21   ;;  %s926_s21 = sphi %s984_s21, %s1225_s21   ;;  %s922_s20 = sphi %s982_s20, %s1224_s20   ;;  %s918_s19 = sphi %s980_s19, %s1223_s19   ;;  %s914_s18 = sphi %s978_s18, %s1222_s18  }
   0x6   : > { %s1003_s24 = sadd.s32 1, %s926_s21   ;;  %s28_s25 = sadd.s32 1, %s922_s20 }
   0x7   : > { %s25_s26 = ssub.s32 %s926_s21, %s1003_s24  ;;  %p35_p0 = scmp.ne.s32.totalorder %s922_s20, %s918_s19 }
   0x8   : > { %p26_p1 = scmp.eq.s32.totalorder %s25_s26, 0  ;;  %p36_p2 = scmp.eq.s32.totalorder %s926_s21, 0 }
   0x9   : > { %p41_p3 = scmp.ne.s32.totalorder %s918_s19, %s914_s18  ;;  %p42_p4 = scmp.eq.s32.totalorder %s999_s22, 0 }
   0xa   : > { %s1015_s27 = scalar_select %p26_p1, %s922_s20, %s28_s25  }
   0xb   : > { %p37_p5 = por %p36_p2, %p35_p0  ;;  %p1017_p6 = por %p42_p4, %p41_p3 }
   0xc   : > { %p149_p7 = scmp.eq.s32.totalorder %s999_s22, 1  ;;  %p155_p8 = scmp.eq.s32.totalorder %s728_s23, 1 }
   0xd   : > { %p761_p10 = scmp.lt.s32.totalorder %s926_s21, 2  ;;  %s187_s6 = sand.u32 1, %s922_s20  }
   0xe   : > { %p1024_p11 = por %p149_p7, %p35_p0  ;;  %p1028_p12 = por %p155_p8, %p41_p3 }
   0xf   : > { %s747_s7 = smul.u32 384, %s926_s21  ;;  %p1039_p13 = pnand %p761_p10, %p37_p5 }
  0x10   : > { %s1214_s29 = scalar_select %p1024_p11, 1, 0 }
  0x11   : > { %s1215_s30 = scalar_select %p1028_p12, 1, 0 }
  0x12   : > { %s746_s8 = smul.u32 24, %s187_s6  ;;  %s1037_s11 = scalar_lea.hbm %s1206_s0, %s747_s7 }
  0x13   : > { %s188_s15 = scalar_lea.sflag [#allocation3], %s187_s6  ;;  %s830_s16 = scalar_lea.hbm %s1037_s11, 384 }
  0x14   : > { %s191_s13 = scalar_lea.vmem [#allocation2], %s746_s8  ;;  %p831_p2 = scmp.ne.s32.totalorder %s1037_s11, %s830_s16 }
  0x15   : > { %s199_s14 = sshll.u32 %s191_s13, 4  ;;  %p832_p3 = pneg %p1039_p13  ;;  %s1044_s14 = int_to_ptr.vmem [resolvable:$true] %s199_s14 }
  0x16   : > { %s835_s25 = scalar_lea.hbm %s1206_s0, 768  ;;  %p836_p7 = scmp.lt.u32.totalorder %s1037_s11, %s1206_s0 }
  0x17   : > { %p833_p4 = pnand %p832_p3, %p831_p2  ;;  %p837_p8 = scmp.lt.u32.totalorder %s835_s25, %s830_s16 }
  0x18   : > { %p839_p9 = scmp.lt.u32.totalorder %s830_s16, %s1037_s11 }
  0x19   : > { %p834_p5 = pneg %p833_p4  ;;  %p838_p10 = por %p837_p8, %p836_p7 }
  0x1b   : > { %p840_p0 = por %p839_p9, %p838_p10 }
  0x1d   : > { %p841_p1 = pnand %p840_p0, %p834_p5 }
  0x1f   : > { %844 = shalt.err (!%p841_p1)
}
  0x20   : > { %s845_s6 = scalar_lea.vmem %s1044_s14, 384  ;;  %s928_s8 = smov [#allocation2]  }
  0x21   : > { %p846_p2 = scmp.ne.s32.totalorder %s1044_s14, %s845_s6  ;;  %s850_s9 = sshll.u32 %s928_s8, 4  ;;  %s851_s9 = int_to_ptr.vmem [resolvable:$false] %s850_s9 }
  0x22   : > { %s852_s10 = scalar_lea.vmem %s851_s9, 768  ;;  %p853_p11 = scmp.lt.s32.totalorder %s1044_s14, %s851_s9 }
  0x23   : > { %p848_p4 = pnand %p846_p2, %p832_p3  ;;  %p854_p7 = scmp.lt.s32.totalorder %s852_s10, %s845_s6 }
  0x25   : > { %p849_p12 = pneg %p848_p4  ;;  %p855_p8 = por %p854_p7, %p853_p11 }
  0x27   : > { %p856_p9 = pnand %p855_p8, %p849_p12 }
  0x29   : > { %859 = shalt.err (!%p856_p9)
}
  0x2a   : > { %756 = dma.hbm_to_vmem [thread:$0]  (!%p1039_p13), %s1037_s11, 384, %s1044_s14, %s188_s15  }
  0x2b   : > { %p1217_p0 = scmp.lt.s32.totalorder %s926_s21, 3  ;;  %p1218_p1 = scmp.ge.s32.totalorder %s926_s21, 1 }
  0x2d   : > { %p205_p3 = pnand %p1218_p1, %p1217_p0 }
  0x2e   : > { %s1077_s13 = sand.u32 (!%p205_p3), 1, %s918_s19  }
  0x2f   : > { %208 = sbr.rel (%p205_p3) target bundleno = 410 (0x19a), region = 40  ;;  %s211_s17 = scalar_lea.sflag (!%p205_p3), [#allocation3], %s1077_s13 }
  0x30   : > { %s748_s16 = smul.u32 (!%p205_p3), 24, %s1077_s13 }
  0x32   : > { %s1081_s23 = scalar_lea.vmem (!%p205_p3), [#allocation2], %s748_s16 }
  0x36   : > { %905 = dma.done.wait (%p1017_p6), %s211_s17, 384  }
  0x37   : > { %907 = vsyncadd (%p1017_p6), %s211_s17, 4294966912  ;;  %v929_v0 = vmov 1   ;;  %v930_v1 = vmov 3   ;;  %v244_v2 = vld [vmem:[%s1207_s1] sm:$0xff]  ;;  %v931_v3 = vmov 2   ;;  %v932_v4 = vmov 4  }
  0x38   : > { %813 = vset.pattern.permute.xlu0 %v929_v0  ;;  %815 = vset.pattern.permute.xlu1 %v930_v1  ;;  %v933_v5 = vmov 5   ;;  %v934_v6 = vmov 6   ;;  %v245_v7 = vld [vmem:[%s1208_s2] sm:$0xff]  ;;  %v935_v8 = vmov 7   ;;  %v936_v9 = vmov 8   ;;  %v1103_v21 = vld [vmem:[%s1081_s23 + $0x10] sm:$0xff] }
  0x39   : > { %325 = vperm.xlu0 %813, %v244_v2   ;;  %371 = vperm.xlu1 %815, %v244_v2   ;;  %v937_v10 = vmov 0   ;;  %v248_v11 = vlaneseq  ;;  %v1100_v20 = vld [vmem:[%s1081_s23] sm:$0xff]  ;;  %v938_v23 = vmov 0.0   ;;  %v242_v27 = vld [vmem:[%s1081_s23 + $0x8] sm:$0xff]  ;;  %s939_s15 = smov 127   ;;  %s940_s25 = smov 126  }
  0x3a   : > { %s941_s26 = smov 112   ;;  %s942_s7 = smov 111   ;;  %vm340_vm6 = vcmask 1039360   ;;  %vm363_vm7 = vcmask 1031168   ;;  %vm386_vm8 = vcmask 916480   ;;  %vm409_vm9 = vcmask 908288  }
  0x3b   : > { %v249_v12 = vand.u32 127, %v248_v11  ;;  %s943_s6 = smov 110   ;;  %s944_s8 = smov 96   ;;  %vm432_vm10 = vcmask 900096   ;;  %vm455_vm11 = vcmask 785408   ;;  %vm478_vm12 = vcmask 777216  }
  0x3c   : > { %s945_s9 = smov 95   ;;  %s946_s10 = smov 94   ;;  %vm501_vm13 = vcmask 769024   ;;  %vm638_vm14 = vcmask 1043456  }
  0x3d   : > { %814 = vset.pattern.permute.xlu0 %v931_v3  ;;  %816 = vset.pattern.permute.xlu1 %v932_v4  ;;  %v250_v13 = vadd.s32 128, %v249_v12  ;;  %v252_v15 = vadd.s32 15, %v249_v12  ;;  %v251_v16 = vadd.s32 256, %v249_v12  ;;  %s733_s12 = sshll.u32 %s1077_s13, 4  ;;  %s745_s28 = sshll.u32 %s999_s22, 8 }
  0x3e   : > { %348 = vperm.xlu0 %814, %v244_v2   ;;  %394 = vperm.xlu1 %816, %v244_v2   ;;  %s240_s14 = scalar_lea.vmem [#allocation5], %s733_s12  ;;  %s644_s22 = scalar_lea.sflag [#allocation4], %s1077_s13 }
  0x3f   : > { %v253_v14 = vadd.s32 15, %v250_v13  ;;  %v259_v18 = vand.u32 15, %v252_v15  ;;  %v254_v19 = vadd.s32 15, %v251_v16  ;;  %p1219_p11 = scmp.ne.s32.totalorder %s1214_s29, 0 }
  0x41   : > { %v266_v17 = vand.u32 15, %v253_v14  ;;  %vm303_vm1 = vcmp.ne.s32.totalorder %v259_v18, 0  ;;  %vm291_vm2 = vcmp.ne.s32.totalorder %v259_v18, 15  ;;  %v273_v22 = vand.u32 15, %v254_v19 }
  0x42   : > { %817 = vset.pattern.permute.xlu1 %v933_v5  ;;  %818 = vset.pattern.permute.xlu0 %v934_v6  ;;  %v737_v26 = vsel %vm303_vm1, 1.0, %v938_v23  ;;  %v734_v30 = vsel %vm291_vm2, 1.0, %v938_v23  ;;  %v246_v5 = vld [vmem:[%s1209_s3] sm:$0xf] }
  0x43   : > { %417 = vperm.xlu1 %817, %v244_v2   ;;  %440 = vperm.xlu0 %818, %v244_v2   ;;  %vm304_vm0 = vcmp.ne.s32.totalorder %v266_v17, 0  ;;  %vm293_vm3 = vcmp.ne.s32.totalorder %v273_v22, 15  ;;  %vm305_vm4 = vcmp.ne.s32.totalorder %v273_v22, 0  ;;  %v1111_v32 = vmul.f32 %v737_v26, %v1100_v20 }
  0x44   : > { %v738_v24 = vsel %vm304_vm0, 1.0, %v938_v23  ;;  %v1114_v33 = vmul.f32 %v734_v30, %v1100_v20  ;;  %vm292_vm5 = vcmp.ne.s32.totalorder %v266_v17, 15  ;;  %v736_v36 = vsel %vm293_vm3, 1.0, %v938_v23 }
  0x45   : > { %v1108_v31 = vmul.f32 %v738_v24, %v242_v27  ;;  %v739_v38 = vsel %vm305_vm4, 1.0, %v938_v23  ;;  %v735_v41 = vsel %vm292_vm5, 1.0, %v938_v23  ;;  %v302_v42 = vmul.f32 %v736_v36, %v1103_v21 }
  0x46   : > { %v314_v44 = vmul.f32 %v739_v38, %v1103_v21  ;;  %v1121_v45 = vmul.f32 %v735_v41, %v242_v27 }
  0x47   : > { %819 = vset.pattern.permute.xlu1 %v935_v8  ;;  %821 = vset.pattern.permute.xlu0 %v929_v0 }
  0x48   : > { %463 = vperm.xlu1 %819, %v244_v2   ;;  %524 = vperm.xlu0 %821, %v245_v7  }
  0x4c   : > { %820 = vset.pattern.permute.xlu1 %v936_v9  ;;  %822 = vset.pattern.permute.xlu0 %v937_v10 }
  0x4d   : > { %486 = vperm.xlu1 %820, %v244_v2   ;;  %317 = vperm.xlu0 %822, %v244_v2  }
  0x51   : > { %518 = vperm.xlu0 %822, %v245_v7   ;;  %823 = vset.pattern.permute.xlu1 %v929_v0  ;;  %v247_v7 = vld [vmem:[%s1210_s4] sm:$0xf] }
  0xb8   : > { %v326_v25 = vpop.permute.xlu0 %325  ;;  %v372_v37 = vpop.permute.xlu1 %371 }
  0xb9   : > { %v328_v28 = vmul.f32 %v326_v25, %v1100_v20  ;;  %v330_v29 = vmul.f32 %v326_v25, %v1103_v21  ;;  %v329_v34 = vmul.f32 %v326_v25, %v242_v27  ;;  %v374_v43 = vmul.f32 %v372_v37, %v1114_v33 }
  0xba   : > { %v376_v47 = vmul.f32 %v372_v37, %v302_v42  ;;  %v375_v49 = vmul.f32 %v372_v37, %v1121_v45 }
  0xbb   : > { %338 = vrot.lane.b32.xlu0 %v330_v29, %s939_s15  ;;  %334 = vrot.lane.b32.xlu1 %v328_v28, %s939_s15 }
  0xbd   : > { %v349_v35 = vpop.permute.xlu0 %348  ;;  %v395_v46 = vpop.permute.xlu1 %394 }
  0xbe   : > { %v352_v39 = vmul.f32 %v349_v35, %v1108_v31  ;;  %v351_v40 = vmul.f32 %v349_v35, %v1111_v32  ;;  %v353_v48 = vmul.f32 %v349_v35, %v314_v44  ;;  %v398_v50 = vmul.f32 %v395_v46, %v242_v27 }
  0xbf   : > { %336 = vrot.lane.b32.xlu1 %v329_v34, %s939_s15  ;;  %v397_v52 = vmul.f32 %v395_v46, %v1100_v20  ;;  %v399_v55 = vmul.f32 %v395_v46, %v1103_v21  ;;  %s658_s15 = sshll.u32 %s240_s14, 4  ;;  %s1164_s15 = int_to_ptr.vmem [resolvable:$true] %s658_s15 }
  0xc0   : > { %359 = vrot.lane.b32.xlu0 %v352_v39, %s940_s25 }
  0xc2   : > { %v418_v51 = vpop.permute.xlu1 %417  ;;  %v441_v56 = vpop.permute.xlu0 %440 }
  0xc3   : > { %357 = vrot.lane.b32.xlu1 %v351_v40, %s940_s25  ;;  %v420_v53 = vmul.f32 %v418_v51, %v1111_v32  ;;  %v422_v54 = vmul.f32 %v418_v51, %v314_v44  ;;  %v421_v57 = vmul.f32 %v418_v51, %v1108_v31  ;;  %v444_v59 = vmul.f32 %v441_v56, %v1121_v45 }
  0xc4   : > { %380 = vrot.lane.b32.xlu0 %v374_v43, %s941_s26  ;;  %v443_v60 = vmul.f32 %v441_v56, %v1114_v33  ;;  %v445_v2 = vmul.f32 %v441_v56, %v302_v42 }
  0xc7   : > { %361 = vrot.lane.b32.xlu1 %v353_v48, %s940_s25  ;;  %v464_v58 = vpop.permute.xlu1 %463  ;;  %v1146_v10 = vpop.permute.xlu0 %524 }
  0xc8   : > { %384 = vrot.lane.b32.xlu0 %v376_v47, %s941_s26  ;;  %v467_v61 = vmul.f32 %v464_v58, %v242_v27  ;;  %v466_v4 = vmul.f32 %v464_v58, %v1100_v20  ;;  %v468_v6 = vmul.f32 %v464_v58, %v1103_v21 }
  0xcb   : > { %382 = vrot.lane.b32.xlu1 %v375_v49, %s941_s26 }
  0xcc   : > { %405 = vrot.lane.b32.xlu0 %v398_v50, %s942_s7  ;;  %v487_v62 = vpop.permute.xlu1 %486  ;;  %v318_v12 = vpop.permute.xlu0 %317 }
  0xcd   : > { %v491_v63 = vmul.f32 %v487_v62, %v314_v44  ;;  %v489_v8 = vmul.f32 %v487_v62, %v1111_v32  ;;  %v490_v9 = vmul.f32 %v487_v62, %v1108_v31  ;;  %v320_v27 = vmul.f32 %v318_v12, %v1114_v33 }
  0xce   : > { %v321_v28 = vmul.f32 %v318_v12, %v1121_v45 }
  0xcf   : > { %403 = vrot.lane.b32.xlu1 %v397_v52, %s942_s7 }
  0xd0   : > { %426 = vrot.lane.b32.xlu0 %v420_v53, %s943_s6  ;;  %v1148_v13 = vpop.permute.xlu0 %518 }
  0xd3   : > { %407 = vrot.lane.b32.xlu1 %v399_v55, %s942_s7  ;;  %s1162_s7 = scalar_lea.hbm %s1211_s5, %s745_s28 }
  0xd4   : > { %430 = vrot.lane.b32.xlu0 %v422_v54, %s943_s6 }
  0xd7   : > { %428 = vrot.lane.b32.xlu1 %v421_v57, %s943_s6  ;;  %s860_s6 = scalar_lea.vmem %s1164_s15, 256 }
  0xd8   : > { %451 = vrot.lane.b32.xlu0 %v444_v59, %s944_s8  ;;  %p861_p6 = scmp.ne.s32.totalorder %s1164_s15, %s860_s6 }
  0xda   : > { %p862_p12 = pnand %p861_p6, %p1219_p11 }
  0xdb   : > { %449 = vrot.lane.b32.xlu1 %v443_v60, %s944_s8 }
  0xdc   : > { %474 = vrot.lane.b32.xlu0 %v467_v61, %s945_s9  ;;  %p863_p13 = pneg %p862_p12 }
  0xdf   : > { %453 = vrot.lane.b32.xlu1 %v445_v2, %s944_s8  ;;  %s947_s8 = smov [#allocation5]  }
  0xe0   : > { %499 = vrot.lane.b32.xlu0 %v491_v63, %s946_s10 }
  0xe3   : > { %472 = vrot.lane.b32.xlu1 %v466_v4, %s945_s9 }
  0xe4   : > { %533 = vperm.xlu0 %822, %v246_v5  }
  0xe7   : > { %476 = vrot.lane.b32.xlu1 %v468_v6, %s945_s9  ;;  %s864_s9 = sshll.u32 %s947_s8, 4  ;;  %s865_s9 = int_to_ptr.vmem [resolvable:$false] %s864_s9 }
  0xe8   : > { %577 = vperm.xlu0 %822, %v247_v7   ;;  %p867_p5 = scmp.lt.s32.totalorder %s1164_s15, %s865_s9 }
  0xeb   : > { %495 = vrot.lane.b32.xlu1 %v489_v8, %s946_s10 }
  0xec   : > { %827 = vset.pattern.permute.xlu0 %v931_v3 }
  0xed   : > { %609 = vperm.xlu0 %827, %v247_v7  }
  0xef   : > { %497 = vrot.lane.b32.xlu1 %v490_v9, %s946_s10  ;;  %s866_s10 = scalar_lea.vmem %s865_s9, 512 }
  0xf0   : > { %p868_p10 = scmp.lt.s32.totalorder %s866_s10, %s860_s6 }
  0xf1   : > { %829 = vset.pattern.permute.xlu0 %v930_v1 }
  0xf2   : > { %p869_p2 = por %p868_p10, %p867_p5 }
  0xf3   : > { %539 = vperm.xlu1 %823, %v246_v5  }
  0xf4   : > { %p870_p4 = pnand %p869_p2, %p863_p13 }
  0xf7   : > { %824 = vset.pattern.permute.xlu1 %v931_v3 }
  0xf8   : > { %554 = vperm.xlu1 %824, %v246_v5  }
  0xfc   : > { %825 = vset.pattern.permute.xlu1 %v930_v1 }
  0xfd   : > { %560 = vperm.xlu1 %825, %v246_v5  }
 0x101   : > { %826 = vset.pattern.permute.xlu1 %v929_v0 }
 0x102   : > { %593 = vperm.xlu1 %826, %v247_v7  }
 0x106   : > { %828 = vset.pattern.permute.xlu1 %v930_v1 }
 0x107   : > { %625 = vperm.xlu1 %828, %v247_v7  }
 0x12d   : > { %v335_v14 = vpop.permute.xlu1 %334  ;;  %v339_v16 = vpop.permute.xlu0 %338 }
 0x131   : > { %v337_v15 = vpop.permute.xlu1 %336 }
 0x132   : > { %v360_v3 = vpop.permute.xlu0 %359  ;;  %v341_v31 = vsel %vm340_vm6, %v335_v14, %v337_v15  ;;  %v342_v32 = vsel %vm340_vm6, %v337_v15, %v339_v16 }
 0x133   : > { %v345_v36 = vadd.f32 %v341_v31, %v320_v27  ;;  %v346_v37 = vadd.f32 %v342_v32, %v321_v28 }
 0x135   : > { %v358_v17 = vpop.permute.xlu1 %357 }
 0x136   : > { %v381_v19 = vpop.permute.xlu0 %380  ;;  %v364_v34 = vsel %vm363_vm7, %v358_v17, %v360_v3 }
 0x137   : > { %v368_v41 = vadd.f32 %v364_v34, %v345_v36 }
 0x139   : > { %v362_v18 = vpop.permute.xlu1 %361 }
 0x13a   : > { %v385_v22 = vpop.permute.xlu0 %384  ;;  %v365_v35 = vsel %vm363_vm7, %v360_v3, %v362_v18 }
 0x13b   : > { %v369_v42 = vadd.f32 %v365_v35, %v346_v37 }
 0x13d   : > { %v383_v20 = vpop.permute.xlu1 %382 }
 0x13e   : > { %v406_v23 = vpop.permute.xlu0 %405  ;;  %v387_v39 = vsel %vm386_vm8, %v381_v19, %v383_v20  ;;  %v388_v40 = vsel %vm386_vm8, %v383_v20, %v385_v22 }
 0x13f   : > { %v391_v45 = vadd.f32 %v387_v39, %v368_v41  ;;  %v392_v46 = vadd.f32 %v388_v40, %v369_v42 }
 0x141   : > { %v404_v21 = vpop.permute.xlu1 %403 }
 0x142   : > { %v427_v25 = vpop.permute.xlu0 %426  ;;  %v410_v43 = vsel %vm409_vm9, %v404_v21, %v406_v23 }
 0x143   : > { %v414_v50 = vadd.f32 %v410_v43, %v391_v45 }
 0x145   : > { %v408_v0 = vpop.permute.xlu1 %407 }
 0x146   : > { %v431_v29 = vpop.permute.xlu0 %430  ;;  %v411_v44 = vsel %vm409_vm9, %v406_v23, %v408_v0 }
 0x147   : > { %v415_v51 = vadd.f32 %v411_v44, %v392_v46 }
 0x149   : > { %v429_v24 = vpop.permute.xlu1 %428 }
 0x14a   : > { %v452_v33 = vpop.permute.xlu0 %451  ;;  %v433_v48 = vsel %vm432_vm10, %v427_v25, %v429_v24  ;;  %v434_v49 = vsel %vm432_vm10, %v429_v24, %v431_v29 }
 0x14b   : > { %v437_v55 = vadd.f32 %v433_v48, %v414_v50  ;;  %v438_v56 = vadd.f32 %v434_v49, %v415_v51 }
 0x14d   : > { %v450_v1 = vpop.permute.xlu1 %449 }
 0x14e   : > { %v475_v52 = vpop.permute.xlu0 %474  ;;  %v456_v53 = vsel %vm455_vm11, %v450_v1, %v452_v33 }
 0x14f   : > { %v460_v60 = vadd.f32 %v456_v53, %v437_v55 }
 0x151   : > { %v454_v26 = vpop.permute.xlu1 %453 }
 0x152   : > { %v457_v54 = vsel %vm455_vm11, %v452_v33, %v454_v26  ;;  %v500_v62 = vpop.permute.xlu0 %499 }
 0x153   : > { %v461_v61 = vadd.f32 %v457_v54, %v438_v56 }
 0x155   : > { %v473_v30 = vpop.permute.xlu1 %472 }
 0x156   : > { %v479_v58 = vsel %vm478_vm12, %v473_v30, %v475_v52 }
 0x157   : > { %v483_v4 = vadd.f32 %v479_v58, %v460_v60 }
 0x159   : > { %v477_v38 = vpop.permute.xlu1 %476 }
 0x15a   : > { %v480_v59 = vsel %vm478_vm12, %v475_v52, %v477_v38 }
 0x15b   : > { %v484_v5 = vadd.f32 %v480_v59, %v461_v61 }
 0x15d   : > { %v496_v47 = vpop.permute.xlu1 %495 }
 0x161   : > { %v498_v57 = vpop.permute.xlu1 %497 }
 0x162   : > { %v502_v63 = vsel %vm501_vm13, %v496_v47, %v498_v57  ;;  %v503_v2 = vsel %vm501_vm13, %v498_v57, %v500_v62 }
 0x163   : > { %v506_v6 = vadd.f32 %v502_v63, %v483_v4  ;;  %v507_v7 = vadd.f32 %v503_v2, %v484_v5  ;;  %v534_v20 = vpop.permute.xlu0 %533 }
 0x165   : > { %v522_v8 = vmul.f32 %v1148_v13, %v507_v7  ;;  %v521_v9 = vmul.f32 %v1148_v13, %v506_v6  ;;  %v568_v13 = vshrl.u32 %v248_v11, 7  ;;  %v510_v37 = vrot.slane %v506_v6, 4 }
 0x166   : > { %v511_v38 = vrot.slane %v507_v7, 4 }
 0x167   : > { %v528_v12 = vadd.f32 %v1146_v10, %v522_v8  ;;  %v527_v14 = vadd.f32 %v1146_v10, %v521_v9  ;;  %v569_v30 = vsub.s32 0, %v568_v13  ;;  %v586_v31 = vsub.s32 1, %v568_v13  ;;  %v578_v32 = vpop.permute.xlu0 %577 }
 0x168   : > { %v602_v34 = vsub.s32 2, %v568_v13  ;;  %v618_v39 = vsub.s32 3, %v568_v13  ;;  %v514_v50 = vmax.f32 %v506_v6, %v510_v37  ;;  %v515_v51 = vmax.f32 %v507_v7, %v511_v38 }
 0x169   : > { %v530_v16 = vmax.f32 %v528_v12, 0.0  ;;  %v529_v17 = vmax.f32 %v527_v14, 0.0 }
 0x16a   : > { %v634_v63 = vrot.slane %v514_v50, 4  ;;  %v635_v2 = vrot.slane %v515_v51, 4 }
 0x16b   : > { %v536_v21 = vmul.f32 %v534_v20, %v529_v17  ;;  %v537_v22 = vmul.f32 %v534_v20, %v530_v16 }
 0x16c   : > { %v610_v44 = vpop.permute.xlu0 %609 }
 0x172   : > { %v540_v15 = vpop.permute.xlu1 %539 }
 0x173   : > { %v541_v3 = vrot.slane %v540_v15, 4 }
 0x175   : > { %v543_v18 = vmul.f32 %v541_v3, %v529_v17  ;;  %v544_v19 = vmul.f32 %v541_v3, %v530_v16 }
 0x177   : > { %v547_v0 = vrot.slane %v543_v18, 4  ;;  %v548_v23 = vrot.slane %v544_v19, 4  ;;  %v555_v24 = vpop.permute.xlu1 %554 }
 0x179   : > { %v551_v1 = vadd.f32 %v547_v0, %v536_v21  ;;  %v552_v25 = vadd.f32 %v548_v23, %v537_v22 }
 0x17b   : > { %v557_v26 = vmul.f32 %v555_v24, %v551_v1  ;;  %v558_v27 = vmul.f32 %v555_v24, %v552_v25 }
 0x17c   : > { %v561_v28 = vpop.permute.xlu1 %560 }
 0x17d   : > { %v563_v10 = vadd.f32 %v561_v28, %v557_v26  ;;  %v564_v29 = vadd.f32 %v561_v28, %v558_v27 }
 0x17f   : > { %v565_v35 = vmax.f32 %v563_v10, 0.0  ;;  %v566_v36 = vmax.f32 %v564_v29, 0.0 }
 0x181   : > { %v594_v40 = vpop.permute.xlu1 %593  ;;  %v570_v41 = vrot.slane %v565_v35, %v569_v30  ;;  %v574_v42 = vrot.slane %v566_v36, %v569_v30  ;;  %v587_v33 = vrot.slane %v565_v35, %v586_v31  ;;  %v591_v11 = vrot.slane %v566_v36, %v586_v31 }
 0x182   : > { %v607_v43 = vrot.slane %v566_v36, %v602_v34  ;;  %v603_v45 = vrot.slane %v565_v35, %v602_v34  ;;  %v619_v52 = vrot.slane %v565_v35, %v618_v39  ;;  %v623_v53 = vrot.slane %v566_v36, %v618_v39 }
 0x183   : > { %v580_v46 = vmul.f32 %v578_v32, %v570_v41  ;;  %v581_v47 = vmul.f32 %v578_v32, %v574_v42  ;;  %v596_v48 = vmul.f32 %v594_v40, %v587_v33  ;;  %v597_v49 = vmul.f32 %v594_v40, %v591_v11 }
 0x184   : > { %v612_v56 = vmul.f32 %v610_v44, %v603_v45  ;;  %v613_v57 = vmul.f32 %v610_v44, %v607_v43 }
 0x185   : > { %v598_v54 = vadd.f32 %v596_v48, %v580_v46  ;;  %v599_v55 = vadd.f32 %v597_v49, %v581_v47 }
 0x186   : > { %v626_v58 = vpop.permute.xlu1 %625 }
 0x187   : > { %v614_v59 = vadd.f32 %v612_v56, %v598_v54  ;;  %v615_v60 = vadd.f32 %v613_v57, %v599_v55  ;;  %v628_v61 = vmul.f32 %v626_v58, %v619_v52  ;;  %v629_v62 = vmul.f32 %v626_v58, %v623_v53 }
 0x189   : > { %v630_v4 = vadd.f32 %v628_v61, %v614_v59  ;;  %v631_v5 = vadd.f32 %v629_v62, %v615_v60 }
 0x18b   : > { %v639_v6 = vsel %vm638_vm14, %v630_v4, %v634_v63  ;;  %v640_v7 = vsel %vm638_vm14, %v631_v5, %v635_v2 }
 0x18c   : > { %641 = vst [vmem:[%s240_s14] sm:$0xff] %v639_v6  ;;  %642 = vst [vmem:[%s240_s14 + $0x8] sm:$0xff] %v640_v7 }
 0x18d   : > { %873 = shalt.err (!%p870_p4)
}
 0x18e   : > { %s874_s13 = scalar_lea.hbm %s1162_s7, 256  ;;  %s878_s23 = scalar_lea.hbm %s1211_s5, 512 }
 0x18f   : > { %p875_p7 = scmp.ne.s32.totalorder %s1162_s7, %s874_s13  ;;  %p879_p0 = scmp.lt.u32.totalorder %s1162_s7, %s1211_s5 }
 0x190   : > { %p880_p1 = scmp.lt.u32.totalorder %s878_s23, %s874_s13  ;;  %p882_p6 = scmp.lt.u32.totalorder %s874_s13, %s1162_s7 }
 0x191   : > { %p876_p8 = pnand %p875_p7, %p1219_p11 }
 0x192   : > { %p881_p3 = por %p880_p1, %p879_p0 }
 0x193   : > { %p877_p9 = pneg %p876_p8 }
 0x194   : > { %p883_p12 = por %p882_p6, %p881_p3 }
 0x196   : > { %p884_p13 = pnand %p883_p12, %p877_p9 }
 0x198   : > { %887 = shalt.err (!%p884_p13)
}
 0x199   : > { %751 = dma.vmem_to_hbm [thread:$0]  (%p1219_p11), %s1164_s15, 256, %s1162_s7, %s644_s22  }
 0x19a PF: > { %s670_s28 = sand.u32 1, %s914_s18   ;;  %p1220_p5 = scmp.ne.s32.totalorder %s1215_s30, 0 }
 0x19b   : > { %p1221_p10 = scmp.ge.s32.totalorder %s926_s21, 2  ;;  %s671_s14 = scalar_lea.sflag [#allocation4], %s670_s28 }
 0x19d   : > { %p758_p2 = pnand %p1221_p10, %p1220_p5 }
 0x19f   : > { %909 = dma.done.wait (!%p758_p2), %s671_s14, 256  }
 0x1a0   : > { %911 = vsyncadd (!%p758_p2), %s671_s14, 4294967040  ;;  %p18_p4 = scmp.ge.s32.totalorder %s1003_s24, 4   ;;  %s1222_s18 = smov %s918_s19 }
 0x1a1   : > { %s1223_s19 = smov %s922_s20  ;;  %s1224_s20 = smov %s1015_s27 }
 0x1a2   : > { %s1225_s21 = smov %s1003_s24  ;;  %20 = sbr.rel (!%p18_p4) target bundleno = 5 (0x5), region = 85 }
 0x1a9   :  { %676 = vsyncpa [#allocation3], 1 }
 0x1aa   :  { %678 = vsyncpa [#allocation3 + $0x1], 1 }
 0x1ab   :  { %679 = vsyncpa [#allocation4], 1 }
 0x1ac   :  { %681 = vsyncpa [#allocation4 + $0x1], 1 }

</bundles_post_ra>
